<compile_context>
chip_gen: v5e
topology: v5e:2x2
jax: 0.10.0
libtpu: 0.0.40
codegen_flags: <defaults>
</compile_context>

<pallas_src>
import functools

import jax
import jax.numpy as jnp
from jax.experimental import pallas as pl
from jax.experimental.pallas import tpu as pltpu  # noqa: F401  (TPU backend)

# ---- small synthetic hyper-parameters (consistent with the module) ----------
B = 2              # batch
L_TOK = 10         # token sequence length fed to ESM2_protlocal.forward
EMB_DIM = 32       # embeddings_dim
KSIZE = 5          # kernel_size
PAD = KSIZE // 4   # conv padding, exactly as in the module (=1)
OUT_DIM = 2        # output_dim
HID = 32           # hidden width of self.linear
VOCAB = 33         # ESM alphabet size
BN_EPS = 1e-5

KC = KSIZE * EMB_DIM      # im2col contraction width (160)
C2 = 2 * EMB_DIM          # fused conv output width  (64)
LANES = 128               # lane-dense output width


def _protlocal_kernel(xc_ref, wslab_ref, vecs_ref, out_ref, *, batch, l_out):
    """Fused conv (im2col, single MXU matmul) + softmax-attention pooling +
    max pooling + Linear/ReLU/BatchNorm + Linear/Sigmoid for the whole batch.

    xc_ref:    (batch*l_out, K*C)      bf16  im2col'ed zero-padded sequence
    wslab_ref: (K*C + 2C + HID, 128)   bf16  packed weights:
                 rows [0 : K*C)          cols [0 : 2C)   fused conv weight
                 rows [K*C : K*C+2C)     cols [0 : HID)  linear-1 weight
                 rows [K*C+2C : +HID)    cols [0 : 128)  linear-2 weight (lane-padded)
    vecs_ref:  (8, 128) f32 packed vectors:
                 row 0: fused conv bias (first 2C lanes)
                 row 1: linear-1 bias   (first HID lanes)
                 row 2: BatchNorm scale (first HID lanes)
                 row 3: BatchNorm shift (first HID lanes)
                 row 4: linear-2 bias   (first OUT_DIM lanes, rest 0)
    out_ref:   (batch, 128) f32 lane-dense; cols [0:OUT_DIM) hold the result.
    """
    C = EMB_DIM

    xc = xc_ref[...]                                          # (B*L, KC) bf16
    w_conv = wslab_ref[0:KC, 0:C2]                            # (KC, 2C) bf16
    w1 = wslab_ref[KC:KC + C2, 0:HID]                         # (2C, HID) bf16
    w2 = wslab_ref[KC + C2:KC + C2 + HID, :]                  # (HID, 128) bf16

    b_conv = vecs_ref[0:1, 0:C2]                              # (1, 2C) f32
    b1 = vecs_ref[1:2, 0:HID]
    bn_scale = vecs_ref[2:3, 0:HID]
    bn_shift = vecs_ref[3:4, 0:HID]
    b2 = vecs_ref[4:5, :]                                     # (1, 128)

    # Both convolutions as a single MXU matmul (feat cols [:C], attn cols [C:]).
    conv = jnp.dot(xc, w_conv, preferred_element_type=jnp.float32) + b_conv
    feat = conv[:, 0:C]                                       # (B*L_out, C)
    attn = conv[:, C:C2]                                      # (B*L_out, C)

    # Dropout(conv_dropout) -> identity in eval mode.
    # Per-sample softmax over the length axis (PyTorch dim=-1 in NCL layout),
    # attention pooling and max pooling. batch is tiny & static -> unrolled.
    pooled = []
    for b in range(batch):
        f = feat[b * l_out:(b + 1) * l_out, :]                # (L_out, C)
        a = attn[b * l_out:(b + 1) * l_out, :]
        m = jnp.max(a, axis=0, keepdims=True)
        e = jnp.exp(a - m)                                    # f32 exp (v5e-safe)
        inv = pl.reciprocal(jnp.sum(e, axis=0, keepdims=True), approx=True)
        p = e * inv
        o1 = jnp.sum(f * p, axis=0, keepdims=True)            # (1, C) attn pool
        o2 = jnp.max(f, axis=0, keepdims=True)                # (1, C) max pool
        pooled.append(jnp.concatenate([o1, o2], axis=-1))     # (1, 2C)
    o = jnp.concatenate(pooled, axis=0)                       # (B, 2C)

    # Linear(2C, 32) -> Dropout(identity) -> ReLU -> BatchNorm1d (folded, eval)
    h = jnp.dot(o.astype(jnp.bfloat16), w1,
                preferred_element_type=jnp.float32) + b1      # (B, HID)
    h = jnp.maximum(h, 0.0)
    h = h * bn_scale + bn_shift

    # Linear(32, output_dim) -> Sigmoid   (lane-padded to a 128-wide store)
    z = jnp.dot(h.astype(jnp.bfloat16), w2,
                preferred_element_type=jnp.float32) + b2      # (B, 128)
    out_ref[...] = jax.nn.sigmoid(z)


@functools.partial(jax.jit, static_argnames=("padding_length",))
def _forward_impl(tokens, padding_length, embed_table, wslab, vecs):
    # --- ESM2Embedding (synthetic): the real module runs a 30-layer ESM2
    # transformer; here it is a deterministic token-embedding lookup with the
    # same slicing / padding interface (shapes preserved).
    # TODO(synk): the full ESM2 transformer stack has no compact Pallas equivalent here.
    batch_residues_original = tokens.shape[1]
    tok = tokens[:, :padding_length]
    emb = embed_table[tok]                                    # (B, pad_len, C)
    pad_back = batch_residues_original - padding_length
    if pad_back > 0:
        emb = jnp.pad(emb, ((0, 0), (0, pad_back), (0, 0)))
    emb = emb[:, 1:emb.shape[1] - 1, :]                       # drop BOS/EOS

    # Conv1d zero padding (kernel_size // 4) along the length axis.
    x_pad = jnp.pad(emb, ((0, 0), (PAD, PAD), (0, 0)))
    Bv, L_pad, _ = x_pad.shape
    L_out = L_pad - KSIZE + 1

    # im2col: (B, L_out, K*C) -> (B*L_out, K*C); both convs become ONE matmul.
    xc = jnp.concatenate([x_pad[:, k:k + L_out, :] for k in range(KSIZE)],
                         axis=-1)
    xc = xc.reshape(Bv * L_out, KC).astype(jnp.bfloat16)

    kernel = functools.partial(_protlocal_kernel, batch=Bv, l_out=L_out)
    out = pl.pallas_call(
        kernel,
        out_shape=jax.ShapeDtypeStruct((Bv, LANES), jnp.float32),
    )(xc, wslab, vecs)
    return out[:, :OUT_DIM]                                   # (B, output_dim)


def protlocal_forward(tokens, mask_lens, packed):
    """Mirrors ESM2_protlocal.forward(x, mask)."""
    padding_length = int(max(mask_lens))
    return _forward_impl(tokens, padding_length, packed["embed_table"],
                         packed["wslab"], packed["vecs"])


def init_params(key):
    ks = jax.random.split(key, 9)

    def u(k, shape, scale):
        return jax.random.uniform(k, shape, jnp.float32, -scale, scale)

    # Conv1d weights (torch: (C_out, C_in, K)) stored pre-transposed as (K, C_in, C_out).
    fan_conv = 1.0 / (EMB_DIM * KSIZE) ** 0.5
    fan1 = 1.0 / (2 * EMB_DIM) ** 0.5
    fan2 = 1.0 / HID ** 0.5
    return dict(
        wf=u(ks[0], (KSIZE, EMB_DIM, EMB_DIM), fan_conv),
        bf=u(ks[1], (1, EMB_DIM), fan_conv),
        wa=u(ks[2], (KSIZE, EMB_DIM, EMB_DIM), fan_conv),
        ba=u(ks[3], (1, EMB_DIM), fan_conv),
        w1=u(ks[4], (2 * EMB_DIM, HID), fan1),
        b1=u(ks[5], (1, HID), fan1),
        w2=u(ks[6], (HID, OUT_DIM), fan2),
        b2=u(ks[7], (1, OUT_DIM), fan2),
        bn_g=jnp.ones((1, HID), jnp.float32),
        bn_b=jnp.zeros((1, HID), jnp.float32),
        bn_mu=jnp.zeros((1, HID), jnp.float32),
        bn_var=jnp.ones((1, HID), jnp.float32),
        embed_table=jax.random.normal(ks[8], (VOCAB, EMB_DIM), jnp.float32) * 0.02,
    )


def pack_params(p):
    """One-time packing of the 12 small tensors into 2 fused slabs (+ table)."""
    # Fused conv weight: im2col layout, feat cols [:C], attn cols [C:2C].
    w_conv = jnp.concatenate(
        [p['wf'].reshape(KC, EMB_DIM), p['wa'].reshape(KC, EMB_DIM)], axis=1)

    wslab = jnp.zeros((KC + C2 + HID, LANES), jnp.float32)
    wslab = wslab.at[0:KC, 0:C2].set(w_conv)
    wslab = wslab.at[KC:KC + C2, 0:HID].set(p['w1'])
    wslab = wslab.at[KC + C2:KC + C2 + HID, 0:OUT_DIM].set(p['w2'])
    wslab = wslab.astype(jnp.bfloat16)

    # Fold eval-mode BatchNorm1d (running stats) into a scale/shift.
    bn_scale = p['bn_g'] * jax.lax.rsqrt(p['bn_var'] + BN_EPS)
    bn_shift = p['bn_b'] - p['bn_mu'] * bn_scale

    vecs = jnp.zeros((8, LANES), jnp.float32)
    vecs = vecs.at[0, 0:C2].set(jnp.concatenate([p['bf'], p['ba']], axis=1)[0])
    vecs = vecs.at[1, 0:HID].set(p['b1'][0])
    vecs = vecs.at[2, 0:HID].set(bn_scale[0])
    vecs = vecs.at[3, 0:HID].set(bn_shift[0])
    vecs = vecs.at[4, 0:OUT_DIM].set(p['b2'][0])

    return dict(embed_table=p['embed_table'], wslab=wslab, vecs=vecs)


if __name__ == "__main__":
    key = jax.random.PRNGKey(0)
    kp, kt = jax.random.split(key)
    packed = pack_params(init_params(kp))

    tokens = jax.random.randint(kt, (B, L_TOK), 0, VOCAB)    # token ids
    mask = [L_TOK, L_TOK - 2]                                # per-sample lengths

    out = protlocal_forward(tokens, mask, packed)
    jax.block_until_ready(out)
    assert out.shape == (B, OUT_DIM), out.shape
    print("KERNEL_OK")
</pallas_src>

<mosaic_0001>
module attributes {stable_mosaic.version = 11 : i64} {
  func.func @_protlocal_kernel(%arg0: memref<12x160xbf16, #tpu.memory_space<vmem>>, %arg1: memref<256x128xbf16, #tpu.memory_space<vmem>>, %arg2: memref<8x128xf32, #tpu.memory_space<vmem>>, %arg3: memref<2x128xf32, #tpu.memory_space<vmem>>) attributes {dimension_semantics = [], scalar_prefetch = 0 : i64, scratch_operands = 0 : i64, tpu.core_type = #tpu.core_type<tc>} {
    %c0 = arith.constant 0 : index
    %c0_0 = arith.constant 0 : index
    %0 = vector.load %arg0[%c0, %c0_0] : memref<12x160xbf16, #tpu.memory_space<vmem>>, vector<12x160xbf16>
    %c0_1 = arith.constant 0 : index
    %c0_2 = arith.constant 0 : index
    %1 = vector.load %arg1[%c0_1, %c0_2] : memref<256x128xbf16, #tpu.memory_space<vmem>>, vector<160x64xbf16>
    %c160 = arith.constant 160 : index
    %c0_3 = arith.constant 0 : index
    %2 = vector.load %arg1[%c160, %c0_3] : memref<256x128xbf16, #tpu.memory_space<vmem>>, vector<64x32xbf16>
    %c224 = arith.constant 224 : index
    %c0_4 = arith.constant 0 : index
    %3 = vector.load %arg1[%c224, %c0_4] : memref<256x128xbf16, #tpu.memory_space<vmem>>, vector<32x128xbf16>
    %c0_5 = arith.constant 0 : index
    %c0_6 = arith.constant 0 : index
    %4 = vector.load %arg2[%c0_5, %c0_6] : memref<8x128xf32, #tpu.memory_space<vmem>>, vector<1x64xf32>
    %c1 = arith.constant 1 : index
    %c0_7 = arith.constant 0 : index
    %5 = vector.load %arg2[%c1, %c0_7] : memref<8x128xf32, #tpu.memory_space<vmem>>, vector<1x32xf32>
    %c2 = arith.constant 2 : index
    %c0_8 = arith.constant 0 : index
    %6 = vector.load %arg2[%c2, %c0_8] : memref<8x128xf32, #tpu.memory_space<vmem>>, vector<1x32xf32>
    %c3 = arith.constant 3 : index
    %c0_9 = arith.constant 0 : index
    %7 = vector.load %arg2[%c3, %c0_9] : memref<8x128xf32, #tpu.memory_space<vmem>>, vector<1x32xf32>
    %c4 = arith.constant 4 : index
    %c0_10 = arith.constant 0 : index
    %8 = vector.load %arg2[%c4, %c0_10] : memref<8x128xf32, #tpu.memory_space<vmem>>, vector<1x128xf32>
    %cst = arith.constant dense<0.000000e+00> : vector<12x64xf32>
    %9 = tpu.matmul %0, %1, %cst {dimension_numbers = #tpu.dot_dimension_numbers<[1], [0], [0], [1], [0, 0, 1, 1], [], []>} : vector<12x160xbf16>, vector<160x64xbf16>, vector<12x64xf32> -> vector<12x64xf32>
    %10 = vector.broadcast %4 : vector<1x64xf32> to vector<12x64xf32>
    %11 = arith.addf %9, %10 : vector<12x64xf32>
    %12 = vector.extract_strided_slice %11 {offsets = [0, 0], sizes = [12, 32], strides = [1, 1]} : vector<12x64xf32> to vector<12x32xf32>
    %13 = vector.extract_strided_slice %11 {offsets = [0, 32], sizes = [12, 32], strides = [1, 1]} : vector<12x64xf32> to vector<12x32xf32>
    %14 = vector.extract_strided_slice %12 {offsets = [0, 0], sizes = [6, 32], strides = [1, 1]} : vector<12x32xf32> to vector<6x32xf32>
    %15 = vector.extract_strided_slice %13 {offsets = [0, 0], sizes = [6, 32], strides = [1, 1]} : vector<12x32xf32> to vector<6x32xf32>
    %cst_11 = arith.constant dense<0xFF800000> : vector<32xf32>
    %16 = vector.multi_reduction <maximumf>, %15, %cst_11 [0] : vector<6x32xf32> to vector<32xf32>
    %17 = vector.shape_cast %16 : vector<32xf32> to vector<1x32xf32>
    %18 = vector.broadcast %17 : vector<1x32xf32> to vector<6x32xf32>
    %19 = arith.subf %15, %18 : vector<6x32xf32>
    %20 = math.exp %19 : vector<6x32xf32>
    %cst_12 = arith.constant dense<0.000000e+00> : vector<32xf32>
    %21 = vector.multi_reduction <add>, %20, %cst_12 [0] : vector<6x32xf32> to vector<32xf32>
    %22 = vector.shape_cast %21 : vector<32xf32> to vector<1x32xf32>
    %23 = tpu.reciprocal %22 {approx = true} : vector<1x32xf32> -> vector<1x32xf32>
    %24 = vector.broadcast %23 : vector<1x32xf32> to vector<6x32xf32>
    %25 = arith.mulf %20, %24 : vector<6x32xf32>
    %26 = arith.mulf %14, %25 : vector<6x32xf32>
    %cst_13 = arith.constant dense<0.000000e+00> : vector<32xf32>
    %27 = vector.multi_reduction <add>, %26, %cst_13 [0] : vector<6x32xf32> to vector<32xf32>
    %28 = vector.shape_cast %27 : vector<32xf32> to vector<1x32xf32>
    %cst_14 = arith.constant dense<0xFF800000> : vector<32xf32>
    %29 = vector.multi_reduction <maximumf>, %14, %cst_14 [0] : vector<6x32xf32> to vector<32xf32>
    %30 = vector.shape_cast %29 : vector<32xf32> to vector<1x32xf32>
    %31 = tpu.concatenate %28, %30 in 1 : vector<1x32xf32>, vector<1x32xf32> -> vector<1x64xf32>
    %32 = vector.extract_strided_slice %12 {offsets = [6, 0], sizes = [6, 32], strides = [1, 1]} : vector<12x32xf32> to vector<6x32xf32>
    %33 = vector.extract_strided_slice %13 {offsets = [6, 0], sizes = [6, 32], strides = [1, 1]} : vector<12x32xf32> to vector<6x32xf32>
    %cst_15 = arith.constant dense<0xFF800000> : vector<32xf32>
    %34 = vector.multi_reduction <maximumf>, %33, %cst_15 [0] : vector<6x32xf32> to vector<32xf32>
    %35 = vector.shape_cast %34 : vector<32xf32> to vector<1x32xf32>
    %36 = vector.broadcast %35 : vector<1x32xf32> to vector<6x32xf32>
    %37 = arith.subf %33, %36 : vector<6x32xf32>
    %38 = math.exp %37 : vector<6x32xf32>
    %cst_16 = arith.constant dense<0.000000e+00> : vector<32xf32>
    %39 = vector.multi_reduction <add>, %38, %cst_16 [0] : vector<6x32xf32> to vector<32xf32>
    %40 = vector.shape_cast %39 : vector<32xf32> to vector<1x32xf32>
    %41 = tpu.reciprocal %40 {approx = true} : vector<1x32xf32> -> vector<1x32xf32>
    %42 = vector.broadcast %41 : vector<1x32xf32> to vector<6x32xf32>
    %43 = arith.mulf %38, %42 : vector<6x32xf32>
    %44 = arith.mulf %32, %43 : vector<6x32xf32>
    %cst_17 = arith.constant dense<0.000000e+00> : vector<32xf32>
    %45 = vector.multi_reduction <add>, %44, %cst_17 [0] : vector<6x32xf32> to vector<32xf32>
    %46 = vector.shape_cast %45 : vector<32xf32> to vector<1x32xf32>
    %cst_18 = arith.constant dense<0xFF800000> : vector<32xf32>
    %47 = vector.multi_reduction <maximumf>, %32, %cst_18 [0] : vector<6x32xf32> to vector<32xf32>
    %48 = vector.shape_cast %47 : vector<32xf32> to vector<1x32xf32>
    %49 = tpu.concatenate %46, %48 in 1 : vector<1x32xf32>, vector<1x32xf32> -> vector<1x64xf32>
    %50 = tpu.concatenate %31, %49 in 0 : vector<1x64xf32>, vector<1x64xf32> -> vector<2x64xf32>
    %51 = arith.truncf %50 : vector<2x64xf32> to vector<2x64xbf16>
    %cst_19 = arith.constant dense<0.000000e+00> : vector<2x32xf32>
    %52 = tpu.matmul %51, %2, %cst_19 {dimension_numbers = #tpu.dot_dimension_numbers<[1], [0], [0], [1], [0, 0, 1, 1], [], []>} : vector<2x64xbf16>, vector<64x32xbf16>, vector<2x32xf32> -> vector<2x32xf32>
    %53 = vector.broadcast %5 : vector<1x32xf32> to vector<2x32xf32>
    %54 = arith.addf %52, %53 : vector<2x32xf32>
    %cst_20 = arith.constant 0.000000e+00 : f32
    %55 = vector.broadcast %cst_20 : f32 to vector<2x32xf32>
    %56 = arith.maximumf %54, %55 : vector<2x32xf32>
    %57 = vector.broadcast %6 : vector<1x32xf32> to vector<2x32xf32>
    %58 = arith.mulf %56, %57 : vector<2x32xf32>
    %59 = vector.broadcast %7 : vector<1x32xf32> to vector<2x32xf32>
    %60 = arith.addf %58, %59 : vector<2x32xf32>
    %61 = arith.truncf %60 : vector<2x32xf32> to vector<2x32xbf16>
    %cst_21 = arith.constant dense<0.000000e+00> : vector<2x128xf32>
    %62 = tpu.matmul %61, %3, %cst_21 {dimension_numbers = #tpu.dot_dimension_numbers<[1], [0], [0], [1], [0, 0, 1, 1], [], []>} : vector<2x32xbf16>, vector<32x128xbf16>, vector<2x128xf32> -> vector<2x128xf32>
    %63 = vector.broadcast %8 : vector<1x128xf32> to vector<2x128xf32>
    %64 = arith.addf %62, %63 : vector<2x128xf32>
    %65 = arith.negf %64 : vector<2x128xf32>
    %66 = math.exp %65 : vector<2x128xf32>
    %cst_22 = arith.constant 1.000000e+00 : f32
    %67 = vector.broadcast %cst_22 : f32 to vector<2x128xf32>
    %68 = arith.addf %67, %66 : vector<2x128xf32>
    %69 = arith.divf %67, %68 : vector<2x128xf32>
    %c0_23 = arith.constant 0 : index
    %c0_24 = arith.constant 0 : index
    %70 = vector.load %arg3[%c0_23, %c0_24] : memref<2x128xf32, #tpu.memory_space<vmem>>, vector<2x128xf32>
    tpu.vector_store %arg3[%c0_23, %c0_24], %69 {strides = array<i32>} : memref<2x128xf32, #tpu.memory_space<vmem>>, vector<2x128xf32>,
    return
  }
}

</mosaic_0001>

<bundles_post_ra>
// kernel: _forward_impl.1
= control target key start
LH: loop header
LB: loop body
LE: loop exit
PB: predicated region body
PF: predicated region fallthrough
CT: control target
= control target key end

     0   :  { %s670_s0 = inlined_call_operand.vmem [shape: bf16[12,160], index: 0, kind: input, shape index: {}]   ;;  %s671_s1 = inlined_call_operand.vmem [shape: bf16[256,128], index: 1, kind: input, shape index: {}]   ;;  %s672_s2 = inlined_call_operand.vmem [shape: f32[8,128], index: 2, kind: input, shape index: {}]   ;;  %s673_s3 = inlined_call_operand.hbm [shape: f32[2,128], index: 3, kind: output, shape index: {}]  }
   0x1   :  { %v479_v0 = vld [vmem:[%s671_s1 + $0x38] sm:$0xff]  ;;  %v481_v1 = vld [vmem:[%s671_s1 + $0x48] sm:$0xff]  ;;  %v478_v2 = vld [vmem:[%s671_s1 + $0x30] sm:$0xff] }
   0x2   :  { %129 = vmatpush.bf16.msra.mxu0 %v479_v0  ;;  %149 = vmatpush.bf16.msra.mxu1 %v481_v1  ;;  %v480_v3 = vld [vmem:[%s671_s1 + $0x40] sm:$0xff]  ;;  %v398_v5 = vld [vmem:[%s670_s0 + $0x8] sm:$0x30] }
   0x3   :  { %v470_v4 = vld [vmem:[%s670_s0 + $0x4] sm:$0xf]  ;;  %v477_v6 = vld [vmem:[%s671_s1 + $0x28] sm:$0xff] }
   0x4   :  { %v401_v7 = vor.u32 %v470_v4, %v398_v5 }
   0x6   :  { %130 = vmatpush.bf16.msra.mxu0 %v478_v2 }
   0x7   :  { %8 = vsyncpa [#allocation3], 0  ;;  %150 = vmatpush.bf16.msra.mxu1 %v480_v3  ;;  %vm125_vm0 = vcmask 261120   ;;  %v476_v8 = vld [vmem:[%s671_s1 + $0x20] sm:$0xff]  ;;  %v475_v9 = vld [vmem:[%s671_s1 + $0x18] sm:$0xff]  ;;  %vm157_vm1 = vcmask 521472  }
   0x8   :  { %v474_v10 = vld [vmem:[%s671_s1 + $0x10] sm:$0xff]  ;;  %v473_v11 = vld [vmem:[%s671_s1 + $0x8] sm:$0xff]  ;;  %v472_v12 = vld [vmem:[%s671_s1] sm:$0xff]  ;;  %vm202_vm2 = vcmask 523526   ;;  %vm204_vm3 = vcmask 519424   ;;  %vm261_vm4 = vcmask 257024  }
   0x9   :  { %v396_v13 = vld [vmem:[%s670_s0] sm:$0xf]  ;;  %v471_v14 = vld [vmem:[%s670_s0 + $0x4] sm:$0x30]  ;;  %vm259_vm5 = vcmask 261126   ;;  %vm182_vm6 = vcmask 259072  }
   0xa   :  { %131 = vmatpush.bf16.msra.mxu0 %v477_v6  ;;  %442 = vmatmul.msk.bf16.vlgmr.msra.gmra.mxu1 %vm125_vm0, %v401_v7  ;;  %v397_v15 = vor.u32 %v471_v14, %v396_v13  ;;  %v496_v16 = vld [vmem:[%s672_s2] ss:$0 sm:$0xff]  ;;  %vm221_vm7 = vcmask 1041408   ;;  %s541_s0 = smov 96   ;;  %s542_s15 = smov 32   ;;  %vm278_vm8 = vcmask 1040384  }
   0xb   :  { %vm306_vm9 = vcmask 523264   ;;  %s543_s8 = smov [#allocation2]  }
   0xc   :  { %s383_s9 = sshll.u32 %s543_s8, 4  ;;  %s384_s9 = int_to_ptr.vmem [resolvable:$true] %s383_s9 }
   0xe   :  { %132 = vmatpush.bf16.msra.mxu0 %v476_v8 }
  0x12   :  { %133 = vmatpush.bf16.msra.mxu0 %v475_v9 }
  0x16   :  { %134 = vmatpush.bf16.msra.mxu0 %v474_v10 }
  0x1a   :  { %135 = vmatpush.bf16.msra.mxu0 %v473_v11 }
  0x1e   :  { %136 = vmatpush.bf16.msra.mxu0 %v472_v12 }
  0x21   :  { %137 = vmatmul.bf16.vlgmr.msra.gmra.mxu0 %v397_v15 }
  0x87   :  { %v152_v17 = vpop.f32.mrf.mxu1 }
  0x8f   :  { %v154_v26 = vpop.f32.mrf.mxu1 }
  0x9e   :  { %v138_v18 = vpop.f32.mrf.mxu0 }
  0x9f   :  { %v139_v19 = vadd.f32 %v496_v16, %v138_v18 }
  0xa1   :  { %v610_v20 = vadd.f32 %v152_v17, %v139_v19 }
  0xa3   :  { %v158_v21 = vsel %vm157_vm1, %v610_v20, -inf  ;;  %v203_v30 = vsel %vm202_vm2, %v610_v20, -inf  ;;  %v260_v46 = vsel %vm259_vm5, %v610_v20, -inf  ;;  %v190_v54 = vsel %vm182_vm6, %v610_v20, -inf }
  0xa4   :  { %v159_v22 = vrot.slane %v158_v21, 4  ;;  %v191_v57 = vrot.slane %v190_v54, 4 }
  0xa6   :  { %v140_v23 = vpop.f32.mrf.mxu0  ;;  %v160_v24 = vmax.f32 %v158_v21, %v159_v22  ;;  %v192_v0 = vmax.f32 %v190_v54, %v191_v57 }
  0xa7   :  { %v141_v25 = vadd.f32 %v496_v16, %v140_v23 }
  0xa8   :  { %v161_v27 = vrot.slane %v160_v24, 2  ;;  %v193_v5 = vrot.slane %v192_v0, 2 }
  0xa9   :  { %v614_v28 = vadd.f32 %v154_v26, %v141_v25  ;;  %v485_v26 = vld [vmem:[%s671_s1 + $0x68] sm:$0xff] }
  0xaa   :  { %v162_v29 = vmax.f32 %v160_v24, %v161_v27  ;;  %v194_v10 = vmax.f32 %v192_v0, %v193_v5  ;;  %314 = vmatpush.bf16.msra.mxu2 %v485_v26  ;;  %v484_v27 = vld [vmem:[%s671_s1 + $0x60] sm:$0xff] }
  0xab   :  { %v205_v31 = vsel %vm204_vm3, %v614_v28, -inf  ;;  %v262_v43 = vsel %vm261_vm4, %v614_v28, -inf }
  0xac   :  { %v206_v32 = vmax.f32 %v203_v30, %v205_v31  ;;  %v163_v33 = vrot.slane %v162_v29, 1  ;;  %v263_v48 = vmax.f32 %v260_v46, %v262_v43  ;;  %v195_v16 = vrot.slane %v194_v10, 1  ;;  %v482_v30 = vld [vmem:[%s671_s1 + $0x50] sm:$0xff] }
  0xae   :  { %v207_v34 = vrot.slane %v206_v32, 4  ;;  %v164_v35 = vmax.f32 %v162_v29, %v163_v33  ;;  %v264_v55 = vrot.slane %v263_v48, 4  ;;  %v196_v21 = vmax.f32 %v194_v10, %v195_v16  ;;  %315 = vmatpush.bf16.msra.mxu2 %v484_v27  ;;  %v483_v29 = vld [vmem:[%s671_s1 + $0x58] sm:$0xff] }
  0xb0   :  { %v208_v36 = vmax.f32 %v206_v32, %v207_v34  ;;  %v165_v37 = vsub.f32 %v610_v20, %v164_v35  ;;  %v265_v59 = vmax.f32 %v263_v48, %v264_v55 }
  0xb2   :  { %v209_v38 = vrot.slane %v208_v36, 2  ;;  %v166_v39 = vmul.f32 1.442695, %v165_v37  ;;  %v266_v3 = vrot.slane %v265_v59, 2  ;;  %316 = vmatpush.bf16.msra.mxu2 %v483_v29 }
  0xb4   :  { %v210_v40 = vmax.f32 %v208_v36, %v209_v38  ;;  %501 = vpow2.f32 %v166_v39  ;;  %v267_v8 = vmax.f32 %v265_v59, %v266_v3  ;;  %v499_v3 = vld [vmem:[%s672_s2 + $0x3] ss:$0 sm:$0xff] }
  0xb6   :  { %v211_v41 = vrot.slane %v210_v40, 1  ;;  %v268_v14 = vrot.slane %v267_v8, 1  ;;  %317 = vmatpush.bf16.msra.mxu2 %v482_v30 }
  0xb8   :  { %v212_v42 = vmax.f32 %v210_v40, %v211_v41  ;;  %v269_v18 = vmax.f32 %v267_v8, %v268_v14  ;;  %v500_v8 = vld [vmem:[%s672_s2 + $0x4] ss:$0 sm:$0xff] }
  0xba   :  { %v502_v44 = vpop.eup %501  ;;  %v214_v45 = vsub.f32 %v614_v28, %v212_v42  ;;  %v213_v47 = vsub.f32 %v610_v20, %v212_v42  ;;  %v491_v22 = vpack.i.bf16 %v196_v21, %v269_v18 }
  0xbb   :  { %v168_v49 = vsel %vm157_vm1, %v502_v44, 0.0 }
  0xbc   :  { %v217_v50 = vmul.f32 1.442695, %v214_v45  ;;  %v169_v51 = vrot.slane %v168_v49, 4  ;;  %v215_v52 = vmul.f32 1.442695, %v213_v47 }
  0xbe   :  { %503 = vpow2.f32 %v217_v50  ;;  %v170_v53 = vadd.f32 %v169_v51, %v168_v49 }
  0xbf   :  { %505 = vpow2.f32 %v215_v52 }
  0xc0   :  { %v171_v56 = vrot.slane %v170_v53, 2 }
  0xc2   :  { %v172_v58 = vadd.f32 %v171_v56, %v170_v53 }
  0xc4   :  { %v504_v60 = vpop.eup %503  ;;  %v173_v61 = vrot.slane %v172_v58, 1 }
  0xc5   :  { %v506_v62 = vpop.eup %505  ;;  %v223_v63 = vrot.slane %v504_v60, 6 }
  0xc6   :  { %v174_v1 = vadd.f32 %v173_v61, %v172_v58  ;;  %v222_v2 = vrot.slane %v506_v62, 6  ;;  %v486_v61 = vld [vmem:[%s671_s1 + $0x70] sm:$0xff] }
  0xc8   :  { %507 = vrcp.f32 %v174_v1  ;;  %v224_v4 = vsel %vm221_vm7, %v222_v2, %v223_v63  ;;  %v498_v1 = vld [vmem:[%s672_s2 + $0x2] ss:$0 sm:$0xff] }
  0xc9   :  { %v226_v6 = vsel %vm157_vm1, %v224_v4, 0.0 }
  0xca   :  { %v227_v7 = vrot.slane %v226_v6, 4 }
  0xcc   :  { %v228_v9 = vadd.f32 %v227_v7, %v226_v6 }
  0xce   :  { %v508_v11 = vpop.eup %507  ;;  %v229_v12 = vrot.slane %v228_v9, 2 }
  0xcf   :  { %v176_v13 = vmul.f32 %v508_v11, %v502_v44 }
  0xd0   :  { %v230_v15 = vadd.f32 %v229_v12, %v228_v9 }
  0xd1   :  { %178 = vrot.lane.b32.xlu1 %v176_v13, %s541_s0 }
  0xd2   :  { %v231_v17 = vrot.slane %v230_v15, 1 }
  0xd4   :  { %v232_v19 = vadd.f32 %v231_v17, %v230_v15 }
  0xd6   :  { %509 = vrcp.f32 %v232_v19 }
  0xd9   :  { %492 = vrot.lane.b32.xlu1 %v491_v22, %s542_s15 }
  0xdc   :  { %v510_v23 = vpop.eup %509 }
  0xdd   :  { %v234_v24 = vmul.f32 %v510_v23, %v506_v62  ;;  %v235_v25 = vmul.f32 %v510_v23, %v504_v60  ;;  %v487_v60 = vld [vmem:[%s671_s1 + $0x78] sm:$0xff]  ;;  %v497_v62 = vld [vmem:[%s672_s2 + $0x1] ss:$0 sm:$0xff]  ;;  %s385_s2 = sshll.u32 %s673_s3, 4  ;;  %s386_s2 = int_to_ptr.hbm [resolvable:$true] %s385_s2 }
  0xde   :  { %351 = vmatpush.bf16.msra.mxu3 %v487_v60 }
  0xdf   :  { %238 = vrot.lane.b32.xlu0 %v234_v24, %s541_s0 }
  0xe2   :  { %352 = vmatpush.bf16.msra.mxu3 %v486_v61 }
  0xe7   :  { %240 = vrot.lane.b32.xlu0 %v235_v25, %s541_s0 }
 0x143   :  { %v179_v31 = vpop.permute.xlu1 %178 }
 0x144   :  { %v181_v32 = vmul.f32 %v179_v31, %v610_v20 }
 0x146   :  { %v183_v34 = vsel %vm182_vm6, %v181_v32, 0.0 }
 0x147   :  { %v184_v35 = vrot.slane %v183_v34, 4 }
 0x149   :  { %v185_v38 = vadd.f32 %v184_v35, %v183_v34 }
 0x14b   :  { %v186_v42 = vrot.slane %v185_v38, 2  ;;  %v493_v51 = vpop.permute.xlu1 %492 }
 0x14c   :  { %v494_v53 = vunpack.i.l.bf16 %v493_v51  ;;  %v495_v55 = vunpack.i.h.bf16 %v493_v51 }
 0x14d   :  { %v187_v46 = vadd.f32 %v186_v42, %v185_v38 }
 0x14f   :  { %v188_v49 = vrot.slane %v187_v46, 1 }
 0x151   :  { %v239_v33 = vpop.permute.xlu0 %238 }
 0x152   :  { %v244_v36 = vmul.f32 %v239_v33, %v610_v20  ;;  %v189_v20 = vadd.f32 %v188_v49, %v187_v46 }
 0x154   :  { %v248_v40 = vrot.slane %v244_v36, 6  ;;  %v201_v57 = vsel %vm125_vm0, %v189_v20, %v495_v55 }
 0x159   :  { %v241_v37 = vpop.permute.xlu0 %240 }
 0x15a   :  { %v245_v39 = vmul.f32 %v241_v37, %v614_v28 }
 0x15c   :  { %v249_v41 = vrot.slane %v245_v39, 6 }
 0x15e   :  { %v250_v43 = vsel %vm221_vm7, %v248_v40, %v249_v41 }
 0x15f   :  { %v252_v44 = vsel %vm182_vm6, %v250_v43, 0.0 }
 0x160   :  { %v253_v45 = vrot.slane %v252_v44, 4 }
 0x162   :  { %v254_v47 = vadd.f32 %v253_v45, %v252_v44 }
 0x164   :  { %v255_v48 = vrot.slane %v254_v47, 2 }
 0x166   :  { %v256_v50 = vadd.f32 %v255_v48, %v254_v47 }
 0x168   :  { %v257_v52 = vrot.slane %v256_v50, 1 }
 0x16a   :  { %v258_v54 = vadd.f32 %v257_v52, %v256_v50 }
 0x16c   :  { %v274_v28 = vsel %vm125_vm0, %v258_v54, %v494_v53 }
 0x16d   :  { %v276_v56 = vrot.slane %v274_v28, 7 }
 0x16f   :  { %v279_v58 = vsel %vm278_vm8, %v201_v57, %v276_v56 }
 0x170   :  { %v280_v59 = vpack.c.bf16 %v279_v58, %v279_v58 }
 0x172   :  { %459 = vmatmul.msk.bf16.vlgmr.msra.gmra.mxu2 %vm306_vm9, %v280_v59 }
 0x1f5   :  { %v319_v63 = vpop.f32.mrf.mxu2 }
 0x1f6   :  { %v320_v0 = vadd.f32 %v497_v62, %v319_v63 }
 0x1f8   :  { %v323_v2 = vmax.f32 %v320_v0, 0.0 }
 0x1fa   :  { %v325_v4 = vmul.f32 %v498_v1, %v323_v2 }
 0x1fc   :  { %v327_v5 = vadd.f32 %v499_v3, %v325_v4 }
 0x1fd   :  { %v321_v6 = vpop.f32.mrf.mxu2 }
 0x1fe   :  { %v328_v7 = vpack.c.bf16 %v327_v5, %v327_v5 }
 0x200   :  { %468 = vmatmul.msk.bf16.vlgmr.msra.gmra.mxu3 %vm125_vm0, %v328_v7 }
 0x283   :  { %v354_v9 = vpop.f32.mrf.mxu3 }
 0x284   :  { %v355_v10 = vadd.f32 %v500_v8, %v354_v9 }
 0x286   :  { %v469_v11 = vmul.f32 -1.442695, %v355_v10 }
 0x288   :  { %511 = vpow2.f32 %v469_v11 }
 0x28b   :  { %v356_v12 = vpop.f32.mrf.mxu3 }
 0x28e   :  { %v512_v13 = vpop.eup %511 }
 0x28f   :  { %v361_v14 = vadd.f32 1.0, %v512_v13 }
 0x291   :  { %513 = vrcp.f32 %v361_v14  ;;  %v373_v18 = vand.u32 2147483648, %v361_v14  ;;  %v371_v21 = vand.u32 2147483647, %v361_v14  ;;  %vm367_vm11 = vweird.f32 %v361_v14 }
 0x293   :  { %v374_v23 = vor.u32 1.1754944e-38, %v373_v18  ;;  %vm372_vm13 = vcmp.eq.f32.partialorder %v371_v21, 8.507059e+37 }
 0x297   :  { %v514_v15 = vpop.eup %513 }
 0x298   :  { %v363_v16 = vmul.f32 %v514_v15, %v361_v14  ;;  %vm368_vm10 = vweird.f32 %v514_v15 }
 0x299   :  { %vm369_vm12 = vmor %vm367_vm11, %vm368_vm10 }
 0x29a   :  { %v364_v17 = vsub.f32 1.0, %v363_v16 }
 0x29c   :  { %v365_v19 = vmul.f32 %v514_v15, %v364_v17 }
 0x29e   :  { %v366_v22 = vadd.f32 %v514_v15, %v365_v19 }
 0x2a0   :  { %v370_v24 = vsel %vm369_vm12, %v514_v15, %v366_v22 }
 0x2a1   :  { %v375_v25 = vsel %vm372_vm13, %v374_v23, %v370_v24 }
 0x2a2   :  { %377 = vst [vmem:[#allocation2] sm:$0x3] %v375_v25 }
 0x2a3   :  { %388 = dma.vmem_to_hbm [thread:$0]  %s384_s9, 32, %s386_s2, [#allocation3]  }
 0x2a4   :  { %539 = dma.done.wait [#allocation3], 32  }
 0x2a5   :  { %540 = vsyncadd [#allocation3], 4294967264 }
 0x2a6   :  { %393 = vsyncpa [#allocation3], 1 }

</bundles_post_ra>
